<compile_context>
chip_gen: v6e
topology: v6e:2x2x1
jax: 0.10.0
libtpu: 0.0.40
codegen_flags: <defaults>
</compile_context>

<pallas_src>
import functools

import jax
import jax.numpy as jnp
from jax.experimental import pallas as pl
from jax.experimental.pallas import tpu as pltpu


# --------------------------------------------------------------------------- #
# Kernel
# --------------------------------------------------------------------------- #
def _mlp_kernel(x_ref, w1_ref, b1_ref, w2_ref, b2_ref, w3_ref, b3_ref,
                w4_ref, b4_ref, o_ref):
    cdt = w1_ref.dtype                       # compute dtype for the MXU dots

    x = x_ref[...]                           # (tn, F), already in compute dtype

    # Layer 1: Linear(F -> H) on the MXU (f32 accumulate); bias + ReLU on the VPU.
    h1 = jnp.dot(x, w1_ref[...], preferred_element_type=jnp.float32)
    h1 = jnp.maximum(h1 + b1_ref[...], 0.0)

    # Dropout(p): identity (PyTorch eval() semantics).
    # TODO(synk): training-mode dropout (pltpu.prng_seed + prng_random_bits mask
    # scaled by 1/(1-p)) is not emitted.

    # Layer 2: Linear(H -> H//2) + ReLU. Cast only at the dot input.
    h2 = jnp.dot(h1.astype(cdt), w2_ref[...], preferred_element_type=jnp.float32)
    h2 = jnp.maximum(h2 + b2_ref[...], 0.0)

    # Layer 3: Linear(H//2 -> H//4) + ReLU.
    h3 = jnp.dot(h2.astype(cdt), w3_ref[...], preferred_element_type=jnp.float32)
    h3 = jnp.maximum(h3 + b3_ref[...], 0.0)

    # Layer 4: Linear(H//4 -> 1). Contract the f32 (1, H//4) weight row against
    # h3 with the RHS transposed (standard trans_b dot, as in flash attention)
    # so the result is a lane-dense (1, tn) row: unmasked stores / dense output
    # DMA instead of a (tn, 1) masked-store column.
    out_row = jax.lax.dot_general(
        w4_ref[...], h3,
        dimension_numbers=(((1,), (1,)), ((), ())),
        preferred_element_type=jnp.float32)              # (1, tn)
    o_ref[...] = (out_row + b4_ref[...]).astype(o_ref.dtype)


# --------------------------------------------------------------------------- #
# Tile sizing / VMEM budgeting (layout-padding aware, generation aware)
# --------------------------------------------------------------------------- #
_MIN_TN = 128          # lane-dense output granularity (multiple of 128 lanes)
_MAX_TN = 16 * 1024    # keep per-step VMEM / regalloc sane


def _round_up(v, m):
    return (v + m - 1) // m * m


def _pad_lane(d):
    return _round_up(max(int(d), 1), 128)


def _pad_sub(d, itemsize):
    return _round_up(max(int(d), 1), max(32 // int(itemsize), 1))   # 8 f32, 16 bf16


def _resident_bytes(f, h, in_bytes):
    """VMEM bytes of the single-buffered resident weights/biases, (8,128)-padded."""
    def wmat(i, o, ib):
        return _pad_sub(i, ib) * _pad_lane(o) * ib
    w = (wmat(f, h, in_bytes) + wmat(h, h // 2, in_bytes)
         + wmat(h // 2, h // 4, in_bytes) + wmat(1, h // 4, 4))     # w4 stays f32
    b = sum(_pad_sub(1, 4) * _pad_lane(d) * 4 for d in (h, h // 2, h // 4, 1))
    return w + b


def _per_row_bytes(f, h, in_bytes):
    """Streaming VMEM bytes per batch row, (8,128)-padded, incl. double-buffering."""
    x_stream = 2 * _pad_lane(f) * in_bytes                           # x tile, 2 bufs
    acts = (_pad_lane(h) + _pad_lane(h // 2) + _pad_lane(h // 4)) * 4
    acts = (acts * 3) // 2                                           # f32 acts + slack
    out = 64                                                         # (8, tn) out, 2 bufs
    return x_stream + acts + out


def _vmem_ceiling_bytes():
    """Usable scoped-VMEM ceiling for this kernel, derived from the chip."""
    try:
        cap = int(pltpu.get_tpu_info().vmem_capacity_bytes)
    except Exception:            # fall back to the smallest (v7x per-TC) VMEM
        cap = 64 << 20
    # Leave headroom for compiler scratch / semaphores / pipeline bookkeeping:
    #   64 MiB (v7x per TC) -> ~52 MiB, 128 MiB (v5e/v6e) -> ~105 MiB.
    return min(cap - (8 << 20), int(cap * 0.82))


def _normalize_tile(tn, n8):
    tn = max(8, _round_up(int(tn), 8))
    if tn >= n8:
        return n8                                   # single tile covering the batch
    return min(_round_up(tn, _MIN_TN), n8)          # multi-tile: lane-dense output


def _auto_batch_tile(n8, f, h, in_bytes, budget_bytes):
    """Largest multiple-of-128 row tile fitting the padded VMEM budget."""
    per_row = max(_per_row_bytes(f, h, in_bytes), 1)
    tn = (int(budget_bytes) // per_row) // _MIN_TN * _MIN_TN
    # Keep >= 2 grid steps when the batch allows it: x-DMA/compute overlap on all
    # chips and dual-TensorCore sharding on v7x.
    half = _round_up(pl.cdiv(n8, 2), _MIN_TN)
    tn = min(max(tn, _MIN_TN), _MAX_TN, max(half, _MIN_TN))
    return min(tn, n8)


# --------------------------------------------------------------------------- #
# Wrapper
# --------------------------------------------------------------------------- #
def regularized_deep_forward(x, params, *, batch_tile=None, compute_dtype=None):
    """x: (N, input_feature) -> (N, 1).  params: see init_params for layouts."""
    n, f = x.shape
    w1, b1 = params["w1"], params["b1"]   # (F, H)      , (1, H)
    w2, b2 = params["w2"], params["b2"]   # (H, H//2)   , (1, H//2)
    w3, b3 = params["w3"], params["b3"]   # (H//2, H//4), (1, H//4)
    w4, b4 = params["w4"], params["b4"]   # (1, H//4)   , (1, 1)
    hidden = w1.shape[1]

    cdt = jnp.dtype(compute_dtype) if compute_dtype is not None else jnp.dtype(x.dtype)
    in_bytes = cdt.itemsize

    # Cast the streaming input and MXU weights at the boundary (halves HBM
    # traffic for bf16); biases and the final-layer weight stay f32.
    xc = x.astype(cdt)
    w1c, w2c, w3c = w1.astype(cdt), w2.astype(cdt), w3.astype(cdt)
    b1f, b2f, b3f = (b.astype(jnp.float32) for b in (b1, b2, b3))
    w4f, b4f = w4.astype(jnp.float32), b4.astype(jnp.float32)

    # Row-pad x to a sublane multiple so every block is well formed.
    n8 = _round_up(n, 8)
    if n8 != n:
        xc = jnp.pad(xc, ((0, n8 - n), (0, 0)))

    # Generation-aware VMEM budgeting (layout-padded estimates, resident included).
    ceiling = _vmem_ceiling_bytes()
    resident = _resident_bytes(f, hidden, in_bytes)
    # TODO(synk): if resident weights alone exceed ~40 MiB (very large F/H on
    # v7x), switch w1 to a K-tiled grid axis with an f32 accumulator instead of
    # keeping all weights fully resident.
    budget = max(ceiling - resident - (4 << 20), 4 << 20)

    if batch_tile is None:
        tn = _auto_batch_tile(n8, f, hidden, in_bytes, budget)
    else:
        tn = _normalize_tile(batch_tile, n8)

    num_tiles = pl.cdiv(n8, tn)
    n_out = num_tiles * tn

    est = resident + tn * _per_row_bytes(f, hidden, in_bytes) + (2 << 20)
    vmem_limit = int(min(ceiling, max(32 << 20, (est * 5) // 4)))

    def resident_spec(arr):
        # Constant block index + single buffer: fetched once, stays resident in VMEM.
        return pl.BlockSpec(arr.shape, lambda i: (0, 0),
                            pipeline_mode=pl.Buffered(buffer_count=1))

    out = pl.pallas_call(
        _mlp_kernel,
        out_shape=jax.ShapeDtypeStruct((1, n_out), x.dtype),
        grid_spec=pltpu.PrefetchScalarGridSpec(
            num_scalar_prefetch=0,
            grid=(num_tiles,),
            in_specs=[
                pl.BlockSpec((tn, f), lambda i: (i, 0)),     # streaming x tile
                resident_spec(w1c), resident_spec(b1f),
                resident_spec(w2c), resident_spec(b2f),
                resident_spec(w3c), resident_spec(b3f),
                resident_spec(w4f), resident_spec(b4f),
            ],
            out_specs=pl.BlockSpec((1, tn), lambda i: (0, i)),   # lane-dense row
        ),
        compiler_params=pltpu.CompilerParams(
            dimension_semantics=("parallel",),
            vmem_limit_bytes=vmem_limit),
    )(xc, w1c, b1f, w2c, b2f, w3c, b3f, w4f, b4f)

    return out[0, :n].reshape(n, 1)


# --------------------------------------------------------------------------- #
# Params / reference
# --------------------------------------------------------------------------- #
def init_params(key, hidden_size, input_feature, dtype=jnp.float32):
    """nn.Linear-style init: U[-1/sqrt(fan_in), +1/sqrt(fan_in)].

    w1..w3 are stored transposed as (in, out) for the kernel's x @ W layout.
    w4 is stored as the PyTorch-native (out=1, in) row so the kernel can apply
    the final layer as a lane-dense trans_b dot.
    """
    h = hidden_size
    dims = [(input_feature, h), (h, h // 2), (h // 2, h // 4), (h // 4, 1)]
    params = {}
    for idx, (fan_in, fan_out) in enumerate(dims, start=1):
        key, kw, kb = jax.random.split(key, 3)
        bound = 1.0 / (fan_in ** 0.5)
        w_shape = (1, fan_in) if idx == 4 else (fan_in, fan_out)
        params[f"w{idx}"] = jax.random.uniform(kw, w_shape, dtype,
                                               minval=-bound, maxval=bound)
        params[f"b{idx}"] = jax.random.uniform(kb, (1, fan_out), dtype,
                                               minval=-bound, maxval=bound)
    return params


def _reference_forward(x, params):
    h = jnp.maximum(x @ params["w1"] + params["b1"], 0.0)
    h = jnp.maximum(h @ params["w2"] + params["b2"], 0.0)
    h = jnp.maximum(h @ params["w3"] + params["b3"], 0.0)
    return h @ params["w4"].T + params["b4"]


# --------------------------------------------------------------------------- #
# Demo / self-check
# --------------------------------------------------------------------------- #
if __name__ == "__main__":
    hidden_size = 32
    input_feature = 16
    batch = 256          # auto tiler -> 2 grid steps of 128 rows

    key = jax.random.PRNGKey(0)
    key, kx = jax.random.split(key)
    x = jax.random.normal(kx, (batch, input_feature), jnp.float32)
    params = init_params(key, hidden_size, input_feature)

    # f32 path, auto batch tiling: checked tightly against the JAX reference.
    fwd = jax.jit(regularized_deep_forward)
    out = jax.block_until_ready(fwd(x, params))
    ref = _reference_forward(x, params)
    assert out.shape == (batch, 1)
    assert jnp.allclose(out, ref, atol=1e-4, rtol=1e-4), "mismatch vs JAX reference"

    # bf16 compute path (halved HBM traffic, f32 accumulation) with an explicit
    # 128-row tile: finiteness + loose accuracy check vs the f32 reference.
    fwd_bf16 = jax.jit(functools.partial(regularized_deep_forward,
                                         batch_tile=128,
                                         compute_dtype=jnp.bfloat16))
    out_bf16 = jax.block_until_ready(fwd_bf16(x, params))
    assert out_bf16.shape == (batch, 1)
    assert bool(jnp.isfinite(out_bf16).all())
    assert jnp.allclose(out_bf16, ref, atol=5e-2, rtol=5e-2), "bf16 path too far off"

    print("KERNEL_OK")
</pallas_src>

<mosaic_0001>
module attributes {stable_mosaic.version = 11 : i64} {
  func.func @_mlp_kernel(%arg0: i32, %arg1: memref<128x16xf32, #tpu.memory_space<vmem>>, %arg2: memref<16x32xf32, #tpu.memory_space<vmem>>, %arg3: memref<1x32xf32, #tpu.memory_space<vmem>>, %arg4: memref<32x16xf32, #tpu.memory_space<vmem>>, %arg5: memref<1x16xf32, #tpu.memory_space<vmem>>, %arg6: memref<16x8xf32, #tpu.memory_space<vmem>>, %arg7: memref<1x8xf32, #tpu.memory_space<vmem>>, %arg8: memref<1x8xf32, #tpu.memory_space<vmem>>, %arg9: memref<1x1xf32, #tpu.memory_space<vmem>>, %arg10: memref<1x128xf32, #tpu.memory_space<vmem>>) attributes {dimension_semantics = [#tpu.dimension_semantics<parallel>], iteration_bounds = array<i64: 2>, scalar_prefetch = 0 : i64, scratch_operands = 0 : i64, tpu.core_type = #tpu.core_type<tc>, window_params = [{transform_indices = @transform_0, window_bounds = array<i64: 128, 16>}, {pipeline_mode = #tpu.pipeline_mode<synchronous>, transform_indices = @transform_1, window_bounds = array<i64: 16, 32>}, {pipeline_mode = #tpu.pipeline_mode<synchronous>, transform_indices = @transform_2, window_bounds = array<i64: 1, 32>}, {pipeline_mode = #tpu.pipeline_mode<synchronous>, transform_indices = @transform_3, window_bounds = array<i64: 32, 16>}, {pipeline_mode = #tpu.pipeline_mode<synchronous>, transform_indices = @transform_4, window_bounds = array<i64: 1, 16>}, {pipeline_mode = #tpu.pipeline_mode<synchronous>, transform_indices = @transform_5, window_bounds = array<i64: 16, 8>}, {pipeline_mode = #tpu.pipeline_mode<synchronous>, transform_indices = @transform_6, window_bounds = array<i64: 1, 8>}, {pipeline_mode = #tpu.pipeline_mode<synchronous>, transform_indices = @transform_7, window_bounds = array<i64: 1, 8>}, {pipeline_mode = #tpu.pipeline_mode<synchronous>, transform_indices = @transform_8, window_bounds = array<i64: 1, 1>}, {transform_indices = @transform_9, window_bounds = array<i64: 1, 128>}]} {
    %c0 = arith.constant 0 : index
    %c0_0 = arith.constant 0 : index
    %0 = vector.load %arg1[%c0, %c0_0] : memref<128x16xf32, #tpu.memory_space<vmem>>, vector<128x16xf32>
    %c0_1 = arith.constant 0 : index
    %c0_2 = arith.constant 0 : index
    %1 = vector.load %arg2[%c0_1, %c0_2] : memref<16x32xf32, #tpu.memory_space<vmem>>, vector<16x32xf32>
    %cst = arith.constant dense<0.000000e+00> : vector<128x32xf32>
    %2 = tpu.matmul %0, %1, %cst {dimension_numbers = #tpu.dot_dimension_numbers<[1], [0], [0], [1], [0, 0, 1, 1], [], []>} : vector<128x16xf32>, vector<16x32xf32>, vector<128x32xf32> -> vector<128x32xf32>
    %c0_3 = arith.constant 0 : index
    %c0_4 = arith.constant 0 : index
    %3 = vector.load %arg3[%c0_3, %c0_4] : memref<1x32xf32, #tpu.memory_space<vmem>>, vector<1x32xf32>
    %4 = vector.broadcast %3 : vector<1x32xf32> to vector<128x32xf32>
    %5 = arith.addf %2, %4 : vector<128x32xf32>
    %cst_5 = arith.constant 0.000000e+00 : f32
    %6 = vector.broadcast %cst_5 : f32 to vector<128x32xf32>
    %7 = arith.maximumf %5, %6 : vector<128x32xf32>
    %c0_6 = arith.constant 0 : index
    %c0_7 = arith.constant 0 : index
    %8 = vector.load %arg4[%c0_6, %c0_7] : memref<32x16xf32, #tpu.memory_space<vmem>>, vector<32x16xf32>
    %cst_8 = arith.constant dense<0.000000e+00> : vector<128x16xf32>
    %9 = tpu.matmul %7, %8, %cst_8 {dimension_numbers = #tpu.dot_dimension_numbers<[1], [0], [0], [1], [0, 0, 1, 1], [], []>} : vector<128x32xf32>, vector<32x16xf32>, vector<128x16xf32> -> vector<128x16xf32>
    %c0_9 = arith.constant 0 : index
    %c0_10 = arith.constant 0 : index
    %10 = vector.load %arg5[%c0_9, %c0_10] : memref<1x16xf32, #tpu.memory_space<vmem>>, vector<1x16xf32>
    %11 = vector.broadcast %10 : vector<1x16xf32> to vector<128x16xf32>
    %12 = arith.addf %9, %11 : vector<128x16xf32>
    %cst_11 = arith.constant 0.000000e+00 : f32
    %13 = vector.broadcast %cst_11 : f32 to vector<128x16xf32>
    %14 = arith.maximumf %12, %13 : vector<128x16xf32>
    %c0_12 = arith.constant 0 : index
    %c0_13 = arith.constant 0 : index
    %15 = vector.load %arg6[%c0_12, %c0_13] : memref<16x8xf32, #tpu.memory_space<vmem>>, vector<16x8xf32>
    %cst_14 = arith.constant dense<0.000000e+00> : vector<128x8xf32>
    %16 = tpu.matmul %14, %15, %cst_14 {dimension_numbers = #tpu.dot_dimension_numbers<[1], [0], [0], [1], [0, 0, 1, 1], [], []>} : vector<128x16xf32>, vector<16x8xf32>, vector<128x8xf32> -> vector<128x8xf32>
    %c0_15 = arith.constant 0 : index
    %c0_16 = arith.constant 0 : index
    %17 = vector.load %arg7[%c0_15, %c0_16] : memref<1x8xf32, #tpu.memory_space<vmem>>, vector<1x8xf32>
    %18 = vector.broadcast %17 : vector<1x8xf32> to vector<128x8xf32>
    %19 = arith.addf %16, %18 : vector<128x8xf32>
    %cst_17 = arith.constant 0.000000e+00 : f32
    %20 = vector.broadcast %cst_17 : f32 to vector<128x8xf32>
    %21 = arith.maximumf %19, %20 : vector<128x8xf32>
    %c0_18 = arith.constant 0 : index
    %c0_19 = arith.constant 0 : index
    %22 = vector.load %arg8[%c0_18, %c0_19] : memref<1x8xf32, #tpu.memory_space<vmem>>, vector<1x8xf32>
    %cst_20 = arith.constant dense<0.000000e+00> : vector<1x128xf32>
    %23 = tpu.matmul %22, %21, %cst_20 {dimension_numbers = #tpu.dot_dimension_numbers<[1], [1], [0], [0], [0, 0, 1, 0], [], []>} : vector<1x8xf32>, vector<128x8xf32>, vector<1x128xf32> -> vector<1x128xf32>
    %c0_21 = arith.constant 0 : index
    %c0_22 = arith.constant 0 : index
    %24 = vector.load %arg9[%c0_21, %c0_22] : memref<1x1xf32, #tpu.memory_space<vmem>>, vector<1x1xf32>
    %25 = vector.broadcast %24 : vector<1x1xf32> to vector<1x128xf32>
    %26 = arith.addf %23, %25 : vector<1x128xf32>
    %c0_23 = arith.constant 0 : index
    %c0_24 = arith.constant 0 : index
    %27 = vector.load %arg10[%c0_23, %c0_24] : memref<1x128xf32, #tpu.memory_space<vmem>>, vector<1x128xf32>
    tpu.vector_store %arg10[%c0_23, %c0_24], %26 {strides = array<i32>} : memref<1x128xf32, #tpu.memory_space<vmem>>, vector<1x128xf32>,
    return
  }
  func.func @transform_0(%arg0: i32) -> (i32, i32) {
    %c0_i32 = arith.constant 0 : i32
    %c0_i32_0 = arith.constant 0 : i32
    return %arg0, %c0_i32 : i32, i32
  }
  func.func @transform_1(%arg0: i32) -> (i32, i32) {
    %c0_i32 = arith.constant 0 : i32
    %c0_i32_0 = arith.constant 0 : i32
    %c0_i32_1 = arith.constant 0 : i32
    return %c0_i32, %c0_i32_0 : i32, i32
  }
  func.func @transform_2(%arg0: i32) -> (i32, i32) {
    %c0_i32 = arith.constant 0 : i32
    %c0_i32_0 = arith.constant 0 : i32
    %c0_i32_1 = arith.constant 0 : i32
    return %c0_i32, %c0_i32_0 : i32, i32
  }
  func.func @transform_3(%arg0: i32) -> (i32, i32) {
    %c0_i32 = arith.constant 0 : i32
    %c0_i32_0 = arith.constant 0 : i32
    %c0_i32_1 = arith.constant 0 : i32
    return %c0_i32, %c0_i32_0 : i32, i32
  }
  func.func @transform_4(%arg0: i32) -> (i32, i32) {
    %c0_i32 = arith.constant 0 : i32
    %c0_i32_0 = arith.constant 0 : i32
    %c0_i32_1 = arith.constant 0 : i32
    return %c0_i32, %c0_i32_0 : i32, i32
  }
  func.func @transform_5(%arg0: i32) -> (i32, i32) {
    %c0_i32 = arith.constant 0 : i32
    %c0_i32_0 = arith.constant 0 : i32
    %c0_i32_1 = arith.constant 0 : i32
    return %c0_i32, %c0_i32_0 : i32, i32
  }
  func.func @transform_6(%arg0: i32) -> (i32, i32) {
    %c0_i32 = arith.constant 0 : i32
    %c0_i32_0 = arith.constant 0 : i32
    %c0_i32_1 = arith.constant 0 : i32
    return %c0_i32, %c0_i32_0 : i32, i32
  }
  func.func @transform_7(%arg0: i32) -> (i32, i32) {
    %c0_i32 = arith.constant 0 : i32
    %c0_i32_0 = arith.constant 0 : i32
    %c0_i32_1 = arith.constant 0 : i32
    return %c0_i32, %c0_i32_0 : i32, i32
  }
  func.func @transform_8(%arg0: i32) -> (i32, i32) {
    %c0_i32 = arith.constant 0 : i32
    %c0_i32_0 = arith.constant 0 : i32
    %c0_i32_1 = arith.constant 0 : i32
    return %c0_i32, %c0_i32_0 : i32, i32
  }
  func.func @transform_9(%arg0: i32) -> (i32, i32) {
    %c0_i32 = arith.constant 0 : i32
    %c0_i32_0 = arith.constant 0 : i32
    return %c0_i32, %arg0 : i32, i32
  }
}

</mosaic_0001>

<bundles_post_ra>
// kernel: regularized_deep_forward.1
= control target key start
LH: loop header
LB: loop body
LE: loop exit
PB: predicated region body
PF: predicated region fallthrough
CT: control target
= control target key end

     0   :  { %s1882_s0 = inlined_call_operand.vmem [shape: f32[256,16], index: 0, kind: input, shape index: {}]   ;;  %s1883_s1 = inlined_call_operand.vmem [shape: f32[16,32], index: 1, kind: input, shape index: {}]   ;;  %s1884_s2 = inlined_call_operand.vmem [shape: f32[1,32], index: 2, kind: input, shape index: {}]   ;;  %s1885_s3 = inlined_call_operand.vmem [shape: f32[32,16], index: 3, kind: input, shape index: {}]   ;;  %s1886_s4 = inlined_call_operand.vmem [shape: f32[1,16], index: 4, kind: input, shape index: {}]   ;;  %s1887_s5 = inlined_call_operand.vmem [shape: f32[16,8], index: 5, kind: input, shape index: {}]   ;;  %s1888_s6 = inlined_call_operand.vmem [shape: f32[1,8], index: 6, kind: input, shape index: {}]   ;;  %s1889_s7 = inlined_call_operand.vmem [shape: f32[1,8], index: 7, kind: input, shape index: {}]   ;;  %s1890_s8 = inlined_call_operand.<no memory space> [shape: f32[1,1], index: 8, kind: input, shape index: {}]   ;;  %s1891_s9 = inlined_call_operand.hbm [shape: f32[1,256], index: 9, kind: output, shape index: {}]  }
   0x1   :  { %v14_v0 = vstv %s1890_s8 }
   0x2   :  { %15 = vst [vmem:[#allocation2] sm:$0x1] %v14_v0 }
   0x3   :  { %16 = vsyncpa [#allocation4], 0 }
   0x4   :  { %18 = vsyncpa [#allocation4 + $0x1], 0  ;;  %s1645_s11 = smov 0   ;;  %s1647_s12 = smov 0  }
   0x5   :  { %s1649_s13 = smov 0   ;;  %s1651_s14 = smov 0  }
   0x6 LB: > { %s1209_s8 = sadd.s32 4294967295, %s1586_s14   ;;  %s1210_s15 = sadd.s32 4294967294, %s1586_s14   ;;  %s1586_s14 = sphi %s1651_s14, %s1897_s14   ;;  %s1582_s13 = sphi %s1649_s13, %s1896_s13   ;;  %s1578_s12 = sphi %s1647_s12, %s1895_s12   ;;  %s1574_s11 = sphi %s1645_s11, %s1894_s11  }
   0x7   : > { %s1668_s16 = sadd.s32 1, %s1586_s14   ;;  %s225_s17 = sadd.s32 1, %s1582_s13 }
   0x8   : > { %s222_s18 = ssub.s32 %s1586_s14, %s1668_s16  ;;  %p235_p0 = scmp.ne.s32.totalorder %s1582_s13, %s1578_s12 }
   0x9   : > { %p223_p1 = scmp.eq.s32.totalorder %s222_s18, 0  ;;  %p236_p2 = scmp.eq.s32.totalorder %s1209_s8, 1 }
   0xa   : > { %p241_p3 = scmp.ne.s32.totalorder %s1578_s12, %s1574_s11  ;;  %p242_p4 = scmp.eq.s32.totalorder %s1210_s15, 1 }
   0xb   : > { %s1678_s19 = scalar_select %p223_p1, %s1582_s13, %s225_s17  }
   0xc   : > { %p1680_p5 = por %p236_p2, %p235_p0  ;;  %p1684_p6 = por %p242_p4, %p241_p3 }
   0xd   : > { %p1213_p7 = scmp.ge.s32.totalorder %s1586_s14, 1  ;;  %p293_p8 = scmp.lt.s32.totalorder %s1586_s14, 3 }
   0xf   : > { %p294_p9 = pnand %p1213_p7, %p293_p8 }
  0x10   : > { %s1696_s26 = sshll.u32 (!%p294_p9), %s1209_s8, 4  ;;  %s326_s25 = sand.u32 (!%p294_p9), 1, %s1578_s12  }
  0x11   : > { %297 = sbr.rel (%p294_p9) target bundleno = 924 (0x39c), region = 56  ;;  %p329_p10 = scmp.lt.s32.totalorder (!%p294_p9), %s1696_s26, 31 }
  0x12   : > { %s1143_s8 = scalar_lea.sflag (!%p294_p9), [#allocation4], %s326_s25  ;;  %s1591_s17 = smov (!%p294_p9), [#allocation3]  }
  0x13   : > { %s1530_s18 = sshll.u32 (!%p294_p9), %s1591_s17, 4  ;;  %s1531_s18 = int_to_ptr.vmem [resolvable:$false] %s1530_s18 }
  0x14   : > { %s1532_s22 = scalar_lea.vmem (!%p294_p9), %s1531_s18, 32 }
  0x16   : > { %v351_v1 = vld [vmem:[%s1883_s1 + $0x8] sm:$0xff]  ;;  %v350_v2 = vld [vmem:[%s1883_s1] sm:$0xff]  ;;  %s330_s27 = scalar_select %p329_p10, %s1696_s26, 31  ;;  %vm359_vm0 = vcmask 130048   ;;  %v572_v19 = vld [vmem:[%s1885_s3 + $0x18] sm:$0xff]  ;;  %vm580_vm1 = vcmask 261120  }
  0x17   : > { %1360 = vmatprep.subr.mxu0 %v351_v1  ;;  %1388 = vmatprep.subr.mxu1 %v572_v19  ;;  %v571_v20 = vld [vmem:[%s1885_s3 + $0x10] sm:$0xff]  ;;  %v570_v21 = vld [vmem:[%s1885_s3 + $0x8] sm:$0xff]  ;;  %v569_v22 = vld [vmem:[%s1885_s3] sm:$0xff]  ;;  %vm1589_vm2 = vmmov 0   ;;  %vm1019_vm3 = vcmask 64512  }
  0x18   : > { %1361 = vmatpush3.msra.mxu0 %v351_v1  ;;  %s1215_s28 = sshll.u32 %s330_s27, 3  ;;  %1389 = vmatpush3.msra.mxu1 %v572_v19  ;;  %v791_v23 = vld [vmem:[%s1887_s5 + $0x8] sm:$0xff]  ;;  %v790_v24 = vld [vmem:[%s1887_s5] sm:$0xff]  ;;  %s327_s27 = scalar_lea.vmem [#allocation3], %s326_s25 }
  0x19   : > { %1362 = vmatprep.subr.mxu0 %v350_v2  ;;  %s1703_s10 = scalar_lea.vmem %s1882_s0, %s1215_s28  ;;  %1390 = vmatprep.subr.mxu1 %v571_v20  ;;  %v1216_v25 = vld [vmem:[%s1884_s2] ss:$0 sm:$0xff]  ;;  %s1155_s28 = sshll.u32 %s327_s27, 4  ;;  %s1156_s28 = int_to_ptr.vmem [resolvable:$true] %s1155_s28 }
  0x1a   : > { %1363 = vmatpush3.msra.mxu0 %v350_v2  ;;  %v334_v3 = vld [vmem:[%s1703_s10] sm:$0xff]  ;;  %v335_v4 = vld [vmem:[%s1703_s10 + $0x8] sm:$0xff]  ;;  %v336_v5 = vld [vmem:[%s1703_s10 + $0x10] sm:$0xff]  ;;  %1391 = vmatpush3.msra.mxu1 %v571_v20  ;;  %s1526_s15 = scalar_lea.vmem %s1156_s28, 16  ;;  %p1533_p0 = scmp.lt.s32.totalorder %s1156_s28, %s1531_s18 }
  0x1b   : > { %1364 = vmatprep.mubr.msk.f32.mxu0 %vm359_vm0, %v334_v3  ;;  %v337_v6 = vld [vmem:[%s1703_s10 + $0x18] sm:$0xff]  ;;  %v338_v7 = vld [vmem:[%s1703_s10 + $0x20] sm:$0xff]  ;;  %v339_v8 = vld [vmem:[%s1703_s10 + $0x28] sm:$0xff]  ;;  %1392 = vmatprep.subr.mxu1 %v570_v21  ;;  %p1527_p11 = scmp.ne.s32.totalorder %s1156_s28, %s1526_s15  ;;  %p1534_p1 = scmp.lt.s32.totalorder %s1532_s22, %s1526_s15 }
  0x1c   : > { %1365 = vmatmul.mubr.msk.f32.vlgmr.msra.gmra.mxu0 %vm359_vm0, %v335_v4  ;;  %v340_v9 = vld [vmem:[%s1703_s10 + $0x30] sm:$0xff]  ;;  %v341_v10 = vld [vmem:[%s1703_s10 + $0x38] sm:$0xff]  ;;  %v342_v11 = vld [vmem:[%s1703_s10 + $0x40] sm:$0xff]  ;;  %1393 = vmatpush3.msra.mxu1 %v570_v21 }
  0x1d   : > { %1367 = vmatprep.mubr.msk.f32.mxu0 %vm359_vm0, %v336_v5  ;;  %v343_v12 = vld [vmem:[%s1703_s10 + $0x48] sm:$0xff]  ;;  %v344_v13 = vld [vmem:[%s1703_s10 + $0x50] sm:$0xff]  ;;  %v345_v14 = vld [vmem:[%s1703_s10 + $0x58] sm:$0xff]  ;;  %1394 = vmatprep.subr.mxu1 %v569_v22  ;;  %p1528_p12 = pnand %p1527_p11, %p1680_p5  ;;  %p1535_p2 = por %p1534_p1, %p1533_p0 }
  0x1e   : > { %v346_v15 = vld [vmem:[%s1703_s10 + $0x60] sm:$0xff]  ;;  %v347_v16 = vld [vmem:[%s1703_s10 + $0x68] sm:$0xff]  ;;  %v348_v17 = vld [vmem:[%s1703_s10 + $0x70] sm:$0xff]  ;;  %1395 = vmatpush3.msra.mxu1 %v569_v22  ;;  %1420 = vmatprep.subr.mxu0 %v791_v23 }
  0x1f   : > { %v349_v18 = vld [vmem:[%s1703_s10 + $0x78] sm:$0xff]  ;;  %1421 = vmatpush3.msra.mxu0 %v791_v23  ;;  %s1847_s10 = scalar_lea.hbm %s1891_s9, %s1696_s26  ;;  %p1529_p13 = pneg %p1528_p12 }
  0x20   : > { %1368 = vmatmul.mubr.msk.f32.gmra.mxu0 %vm359_vm0, %v337_v6  ;;  %1422 = vmatprep.subr.mxu0 %v790_v24 }
  0x21   : > { %1370 = vmatprep.mubr.msk.f32.mxu0 %vm359_vm0, %v338_v7  ;;  %1423 = vmatpush3.msra.mxu0 %v790_v24  ;;  %p1536_p3 = pnand %p1535_p2, %p1529_p13 }
  0x24   : > { %1371 = vmatmul.mubr.msk.f32.gmra.mxu0 %vm359_vm0, %v339_v8 }
  0x25   : > { %1373 = vmatprep.mubr.msk.f32.mxu0 %vm359_vm0, %v340_v9 }
  0x28   : > { %1374 = vmatmul.mubr.msk.f32.gmra.mxu0 %vm359_vm0, %v341_v10  ;;  %v1233_v10 = vld [vmem:[%s1886_s4] ss:$0 sm:$0xff] }
  0x29   : > { %1376 = vmatprep.mubr.msk.f32.mxu0 %vm359_vm0, %v342_v11 }
  0x2c   : > { %1377 = vmatmul.mubr.msk.f32.gmra.mxu0 %vm359_vm0, %v343_v12 }
  0x2d   : > { %1379 = vmatprep.mubr.msk.f32.mxu0 %vm359_vm0, %v344_v13 }
  0x30   : > { %1380 = vmatmul.mubr.msk.f32.gmra.mxu0 %vm359_vm0, %v345_v14 }
  0x31   : > { %1382 = vmatprep.mubr.msk.f32.mxu0 %vm359_vm0, %v346_v15 }
  0x34   : > { %1383 = vmatmul.mubr.msk.f32.gmra.mxu0 %vm359_vm0, %v347_v16 }
  0x35   : > { %1385 = vmatprep.mubr.msk.f32.mxu0 %vm359_vm0, %v348_v17 }
  0x38   : > { %1386 = vmatmul.mubr.msk.f32.gmra.mxu0 %vm359_vm0, %v349_v18 }
  0xdc   : > { %v1366_v26 = vpop.f32.mrf.mxu0 }
  0xdd   : > { %v480_v27 = vadd.f32 %v1366_v26, %v1216_v25 }
  0xde   : > { %v474_v28 = vpop.f32.mrf.mxu0 }
  0xdf   : > { %v475_v29 = vadd.f32 %v1216_v25, %v474_v28  ;;  %v554_v32 = vmax.f32 %v480_v27, 0.0 }
  0xe0   : > { %v1369_v30 = vpop.f32.mrf.mxu0 }
  0xe1   : > { %v553_v31 = vmax.f32 %v475_v29, 0.0  ;;  %v490_v33 = vadd.f32 %v1369_v30, %v1216_v25 }
  0xe2   : > { %v484_v34 = vpop.f32.mrf.mxu0 }
  0xe3   : > { %v485_v35 = vadd.f32 %v1216_v25, %v484_v34  ;;  %1396 = vmatprep.mubr.msk.f32.mxu1 %vm580_vm1, %v553_v31  ;;  %v556_v38 = vmax.f32 %v490_v33, 0.0 }
  0xe4   : > { %v1372_v36 = vpop.f32.mrf.mxu0  ;;  %1397 = vmatmul.mubr.msk.f32.vlgmr.msra.gmra.mxu1 %vm580_vm1, %v554_v32 }
  0xe5   : > { %v555_v37 = vmax.f32 %v485_v35, 0.0  ;;  %v500_v39 = vadd.f32 %v1372_v36, %v1216_v25 }
  0xe6   : > { %v494_v40 = vpop.f32.mrf.mxu0 }
  0xe7   : > { %v495_v41 = vadd.f32 %v1216_v25, %v494_v40  ;;  %1399 = vmatprep.mubr.msk.f32.mxu1 %vm580_vm1, %v555_v37  ;;  %v558_v44 = vmax.f32 %v500_v39, 0.0 }
  0xe8   : > { %v1375_v42 = vpop.f32.mrf.mxu0  ;;  %1400 = vmatmul.mubr.msk.f32.gmra.mxu1 %vm580_vm1, %v556_v38 }
  0xe9   : > { %v557_v43 = vmax.f32 %v495_v41, 0.0  ;;  %v510_v45 = vadd.f32 %v1375_v42, %v1216_v25 }
  0xea   : > { %v504_v46 = vpop.f32.mrf.mxu0 }
  0xeb   : > { %v505_v47 = vadd.f32 %v1216_v25, %v504_v46  ;;  %1402 = vmatprep.mubr.msk.f32.mxu1 %vm580_vm1, %v557_v43  ;;  %v560_v50 = vmax.f32 %v510_v45, 0.0 }
  0xec   : > { %v1378_v48 = vpop.f32.mrf.mxu0  ;;  %1403 = vmatmul.mubr.msk.f32.gmra.mxu1 %vm580_vm1, %v558_v44 }
  0xed   : > { %v559_v49 = vmax.f32 %v505_v47, 0.0  ;;  %v520_v51 = vadd.f32 %v1378_v48, %v1216_v25 }
  0xee   : > { %v514_v52 = vpop.f32.mrf.mxu0 }
  0xef   : > { %v515_v53 = vadd.f32 %v1216_v25, %v514_v52  ;;  %1405 = vmatprep.mubr.msk.f32.mxu1 %vm580_vm1, %v559_v49  ;;  %v562_v56 = vmax.f32 %v520_v51, 0.0 }
  0xf0   : > { %v1381_v54 = vpop.f32.mrf.mxu0  ;;  %1406 = vmatmul.mubr.msk.f32.gmra.mxu1 %vm580_vm1, %v560_v50 }
  0xf1   : > { %v561_v55 = vmax.f32 %v515_v53, 0.0  ;;  %v530_v57 = vadd.f32 %v1381_v54, %v1216_v25 }
  0xf2   : > { %v524_v58 = vpop.f32.mrf.mxu0 }
  0xf3   : > { %v525_v59 = vadd.f32 %v1216_v25, %v524_v58  ;;  %1408 = vmatprep.mubr.msk.f32.mxu1 %vm580_vm1, %v561_v55  ;;  %v564_v62 = vmax.f32 %v530_v57, 0.0 }
  0xf4   : > { %v1384_v60 = vpop.f32.mrf.mxu0  ;;  %1409 = vmatmul.mubr.msk.f32.gmra.mxu1 %vm580_vm1, %v562_v56 }
  0xf5   : > { %v563_v61 = vmax.f32 %v525_v59, 0.0  ;;  %v540_v63 = vadd.f32 %v1384_v60, %v1216_v25  ;;  %v1588_v59 = vmov 0.0   ;;  %v1009_v60 = vld [vmem:[#allocation2] sm:$0x1] }
  0xf6   : > { %v534_v0 = vpop.f32.mrf.mxu0  ;;  %1448 = vmatprep.subr.mxu1 %v1588_v59 }
  0xf7   : > { %v535_v1 = vadd.f32 %v1216_v25, %v534_v0  ;;  %1411 = vmatprep.mubr.msk.f32.mxu1 %vm580_vm1, %v563_v61  ;;  %v566_v4 = vmax.f32 %v540_v63, 0.0  ;;  %v1590_v61 = vmov 0  }
  0xf8   : > { %v1387_v2 = vpop.f32.mrf.mxu0  ;;  %1412 = vmatmul.mubr.msk.f32.gmra.mxu1 %vm580_vm1, %v564_v62  ;;  %1525 = vset.pattern.permute.xlu0 %v1590_v61 }
  0xf9   : > { %v565_v3 = vmax.f32 %v535_v1, 0.0  ;;  %v550_v5 = vadd.f32 %v1387_v2, %v1216_v25  ;;  %1012 = vperm.xlu0 %1525, %v1009_v60  }
  0xfa   : > { %v544_v6 = vpop.f32.mrf.mxu0 }
  0xfb   : > { %v545_v7 = vadd.f32 %v1216_v25, %v544_v6  ;;  %1414 = vmatprep.mubr.msk.f32.mxu1 %vm580_vm1, %v565_v3  ;;  %v568_v9 = vmax.f32 %v550_v5, 0.0 }
  0xfc   : > { %1415 = vmatmul.mubr.msk.f32.gmra.mxu1 %vm580_vm1, %v566_v4 }
  0xfd   : > { %v567_v8 = vmax.f32 %v545_v7, 0.0 }
  0xff   : > { %1417 = vmatprep.mubr.msk.f32.mxu1 %vm580_vm1, %v567_v8 }
 0x100   : > { %1418 = vmatmul.mubr.msk.f32.gmra.mxu1 %vm580_vm1, %v568_v9 }
 0x101   : > { %1480 = vmatprep.mubr.msk.f32.mxu1 %vm1589_vm2, %v1588_v59 }
 0x1a4   : > { %v1398_v11 = vpop.f32.mrf.mxu1 }
 0x1a5   : > { %v701_v12 = vadd.f32 %v1398_v11, %v1233_v10 }
 0x1a6   : > { %v695_v13 = vpop.f32.mrf.mxu1 }
 0x1a7   : > { %v696_v14 = vadd.f32 %v1233_v10, %v695_v13  ;;  %v775_v17 = vmax.f32 %v701_v12, 0.0  ;;  %v1250_v12 = vld [vmem:[%s1888_s6] ss:$0 sm:$0xff] }
 0x1a8   : > { %v1401_v15 = vpop.f32.mrf.mxu1 }
 0x1a9   : > { %v774_v16 = vmax.f32 %v696_v14, 0.0  ;;  %v711_v18 = vadd.f32 %v1401_v15, %v1233_v10 }
 0x1aa   : > { %v705_v19 = vpop.f32.mrf.mxu1 }
 0x1ab   : > { %v706_v20 = vadd.f32 %v1233_v10, %v705_v19  ;;  %1424 = vmatprep.mubr.msk.f32.mxu0 %vm359_vm0, %v774_v16  ;;  %v777_v23 = vmax.f32 %v711_v18, 0.0 }
 0x1ac   : > { %v1404_v21 = vpop.f32.mrf.mxu1  ;;  %1425 = vmatmul.mubr.msk.f32.vlgmr.msra.gmra.mxu0 %vm359_vm0, %v775_v17 }
 0x1ad   : > { %v776_v22 = vmax.f32 %v706_v20, 0.0  ;;  %v721_v24 = vadd.f32 %v1404_v21, %v1233_v10 }
 0x1ae   : > { %v715_v25 = vpop.f32.mrf.mxu1 }
 0x1af   : > { %v716_v26 = vadd.f32 %v1233_v10, %v715_v25  ;;  %1427 = vmatprep.mubr.msk.f32.mxu0 %vm359_vm0, %v776_v22  ;;  %v779_v29 = vmax.f32 %v721_v24, 0.0 }
 0x1b0   : > { %v1407_v27 = vpop.f32.mrf.mxu1  ;;  %1428 = vmatmul.mubr.msk.f32.gmra.mxu0 %vm359_vm0, %v777_v23 }
 0x1b1   : > { %v778_v28 = vmax.f32 %v716_v26, 0.0  ;;  %v731_v30 = vadd.f32 %v1407_v27, %v1233_v10 }
 0x1b2   : > { %v725_v31 = vpop.f32.mrf.mxu1 }
 0x1b3   : > { %v726_v32 = vadd.f32 %v1233_v10, %v725_v31  ;;  %1430 = vmatprep.mubr.msk.f32.mxu0 %vm359_vm0, %v778_v28  ;;  %v781_v35 = vmax.f32 %v731_v30, 0.0 }
 0x1b4   : > { %v1410_v33 = vpop.f32.mrf.mxu1  ;;  %1431 = vmatmul.mubr.msk.f32.gmra.mxu0 %vm359_vm0, %v779_v29 }
 0x1b5   : > { %v780_v34 = vmax.f32 %v726_v32, 0.0  ;;  %v741_v36 = vadd.f32 %v1410_v33, %v1233_v10 }
 0x1b6   : > { %v735_v37 = vpop.f32.mrf.mxu1 }
 0x1b7   : > { %v736_v38 = vadd.f32 %v1233_v10, %v735_v37  ;;  %1433 = vmatprep.mubr.msk.f32.mxu0 %vm359_vm0, %v780_v34  ;;  %v783_v41 = vmax.f32 %v741_v36, 0.0 }
 0x1b8   : > { %v1413_v39 = vpop.f32.mrf.mxu1  ;;  %1434 = vmatmul.mubr.msk.f32.gmra.mxu0 %vm359_vm0, %v781_v35 }
 0x1b9   : > { %v782_v40 = vmax.f32 %v736_v38, 0.0  ;;  %v751_v42 = vadd.f32 %v1413_v39, %v1233_v10 }
 0x1ba   : > { %v745_v43 = vpop.f32.mrf.mxu1 }
 0x1bb   : > { %v746_v44 = vadd.f32 %v1233_v10, %v745_v43  ;;  %1436 = vmatprep.mubr.msk.f32.mxu0 %vm359_vm0, %v782_v40  ;;  %v785_v47 = vmax.f32 %v751_v42, 0.0 }
 0x1bc   : > { %v1416_v45 = vpop.f32.mrf.mxu1  ;;  %1437 = vmatmul.mubr.msk.f32.gmra.mxu0 %vm359_vm0, %v783_v41 }
 0x1bd   : > { %v784_v46 = vmax.f32 %v746_v44, 0.0  ;;  %v761_v48 = vadd.f32 %v1416_v45, %v1233_v10 }
 0x1be   : > { %v755_v49 = vpop.f32.mrf.mxu1 }
 0x1bf   : > { %v756_v50 = vadd.f32 %v1233_v10, %v755_v49  ;;  %1439 = vmatprep.mubr.msk.f32.mxu0 %vm359_vm0, %v784_v46  ;;  %v787_v53 = vmax.f32 %v761_v48, 0.0  ;;  %v1015_v48 = vlaneseq }
 0x1c0   : > { %v1419_v51 = vpop.f32.mrf.mxu1  ;;  %1440 = vmatmul.mubr.msk.f32.gmra.mxu0 %vm359_vm0, %v785_v47  ;;  %v1008_v47 = vld [vmem:[%s1889_s7] sm:$0x1] }
 0x1c1   : > { %v786_v52 = vmax.f32 %v756_v50, 0.0  ;;  %v771_v54 = vadd.f32 %v1419_v51, %v1233_v10  ;;  %v1016_v49 = vshrl.u32 %v1015_v48, 7  ;;  %v1013_v51 = vpop.permute.xlu0 %1012 }
 0x1c2   : > { %v765_v55 = vpop.f32.mrf.mxu1 }
 0x1c3   : > { %v766_v56 = vadd.f32 %v1233_v10, %v765_v55  ;;  %1442 = vmatprep.mubr.msk.f32.mxu0 %vm359_vm0, %v786_v52  ;;  %v789_v58 = vmax.f32 %v771_v54, 0.0  ;;  %v1017_v50 = vsub.s32 0, %v1016_v49 }
 0x1c4   : > { %1443 = vmatmul.mubr.msk.f32.gmra.mxu0 %vm359_vm0, %v787_v53 }
 0x1c5   : > { %v788_v57 = vmax.f32 %v766_v56, 0.0  ;;  %v1018_v52 = vrot.slane %v1013_v51, %v1017_v50 }
 0x1c7   : > { %1445 = vmatprep.mubr.msk.f32.mxu0 %vm359_vm0, %v788_v57 }
 0x1c8   : > { %1446 = vmatmul.mubr.msk.f32.gmra.mxu0 %vm359_vm0, %v789_v58 }
 0x26c   : > { %v1795_v62 = vpop.f32.mrf.mxu0 }
 0x26d   : > { %v919_v42 = vadd.f32 %v1795_v62, %v1250_v12 }
 0x26e   : > { %v1797_v63 = vpop.f32.mrf.mxu0 }
 0x26f   : > { %v993_v44 = vmax.f32 %v919_v42, 0.0  ;;  %v914_v45 = vadd.f32 %v1250_v12, %v1797_v63 }
 0x270   : > { %v1429_v0 = vpop.f32.mrf.mxu0 }
 0x271   : > { %v929_v38 = vadd.f32 %v1429_v0, %v1250_v12  ;;  %v992_v46 = vmax.f32 %v914_v45, 0.0 }
 0x272   : > { %v1799_v1 = vpop.f32.mrf.mxu0 }
 0x273   : > { %v995_v40 = vmax.f32 %v929_v38, 0.0  ;;  %v924_v41 = vadd.f32 %v1250_v12, %v1799_v1 }
 0x274   : > { %v1432_v2 = vpop.f32.mrf.mxu0 }
 0x275   : > { %v939_v34 = vadd.f32 %v1432_v2, %v1250_v12  ;;  %v994_v43 = vmax.f32 %v924_v41, 0.0 }
 0x276   : > { %v933_v3 = vpop.f32.mrf.mxu0 }
 0x277   : > { %v997_v36 = vmax.f32 %v939_v34, 0.0  ;;  %v934_v37 = vadd.f32 %v1250_v12, %v933_v3 }
 0x278   : > { %v1435_v4 = vpop.f32.mrf.mxu0 }
 0x279   : > { %v949_v30 = vadd.f32 %v1435_v4, %v1250_v12  ;;  %v996_v39 = vmax.f32 %v934_v37, 0.0 }
 0x27a   : > { %v943_v5 = vpop.f32.mrf.mxu0 }
 0x27b   : > { %v999_v32 = vmax.f32 %v949_v30, 0.0  ;;  %v944_v33 = vadd.f32 %v1250_v12, %v943_v5 }
 0x27c   : > { %v1438_v6 = vpop.f32.mrf.mxu0 }
 0x27d   : > { %v959_v26 = vadd.f32 %v1438_v6, %v1250_v12  ;;  %v998_v35 = vmax.f32 %v944_v33, 0.0 }
 0x27e   : > { %v953_v7 = vpop.f32.mrf.mxu0 }
 0x27f   : > { %v1001_v28 = vmax.f32 %v959_v26, 0.0  ;;  %v954_v29 = vadd.f32 %v1250_v12, %v953_v7 }
 0x280   : > { %v1441_v8 = vpop.f32.mrf.mxu0 }
 0x281   : > { %v969_v22 = vadd.f32 %v1441_v8, %v1250_v12  ;;  %v1000_v31 = vmax.f32 %v954_v29, 0.0 }
 0x282   : > { %v963_v9 = vpop.f32.mrf.mxu0 }
 0x283   : > { %v1003_v24 = vmax.f32 %v969_v22, 0.0  ;;  %v964_v25 = vadd.f32 %v1250_v12, %v963_v9 }
 0x284   : > { %v1444_v10 = vpop.f32.mrf.mxu0 }
 0x285   : > { %v979_v18 = vadd.f32 %v1444_v10, %v1250_v12  ;;  %v1002_v27 = vmax.f32 %v964_v25, 0.0 }
 0x286   : > { %v973_v11 = vpop.f32.mrf.mxu0 }
 0x287   : > { %v1005_v20 = vmax.f32 %v979_v18, 0.0  ;;  %v974_v21 = vadd.f32 %v1250_v12, %v973_v11 }
 0x288   : > { %v1447_v13 = vpop.f32.mrf.mxu0 }
 0x289   : > { %v989_v14 = vadd.f32 %v1447_v13, %v1250_v12  ;;  %v1004_v23 = vmax.f32 %v974_v21, 0.0 }
 0x28a   : > { %v983_v15 = vpop.f32.mrf.mxu0 }
 0x28b   : > { %v1007_v16 = vmax.f32 %v989_v14, 0.0  ;;  %v984_v17 = vadd.f32 %v1250_v12, %v983_v15 }
 0x28d   : > { %1449 = vmatpush3.xpose.msk.msra.mxu1 %vm1019_vm3, %v1007_v16  ;;  %v1006_v19 = vmax.f32 %v984_v17, 0.0 }
 0x28e   : > { %1450 = vmatprep.subr.mxu1 %v1588_v59 }
 0x291   : > { %1451 = vmatpush3.xpose.msk.msra.mxu1 %vm1019_vm3, %v1006_v19 }
 0x292   : > { %1452 = vmatprep.subr.mxu1 %v1588_v59 }
 0x295   : > { %1453 = vmatpush3.xpose.msk.msra.mxu1 %vm1019_vm3, %v1005_v20 }
 0x296   : > { %1454 = vmatprep.subr.mxu1 %v1588_v59 }
 0x299   : > { %1455 = vmatpush3.xpose.msk.msra.mxu1 %vm1019_vm3, %v1004_v23 }
 0x29a   : > { %1456 = vmatprep.subr.mxu1 %v1588_v59 }
 0x29d   : > { %1457 = vmatpush3.xpose.msk.msra.mxu1 %vm1019_vm3, %v1003_v24 }
 0x29e   : > { %1458 = vmatprep.subr.mxu1 %v1588_v59 }
 0x2a1   : > { %1459 = vmatpush3.xpose.msk.msra.mxu1 %vm1019_vm3, %v1002_v27 }
 0x2a2   : > { %1460 = vmatprep.subr.mxu1 %v1588_v59 }
 0x2a5   : > { %1461 = vmatpush3.xpose.msk.msra.mxu1 %vm1019_vm3, %v1001_v28 }
 0x2a6   : > { %1462 = vmatprep.subr.mxu1 %v1588_v59 }
 0x2a9   : > { %1463 = vmatpush3.xpose.msk.msra.mxu1 %vm1019_vm3, %v1000_v31 }
 0x2aa   : > { %1464 = vmatprep.subr.mxu1 %v1588_v59 }
 0x2ad   : > { %1465 = vmatpush3.xpose.msk.msra.mxu1 %vm1019_vm3, %v999_v32 }
 0x2ae   : > { %1466 = vmatprep.subr.mxu1 %v1588_v59 }
 0x2b1   : > { %1467 = vmatpush3.xpose.msk.msra.mxu1 %vm1019_vm3, %v998_v35 }
 0x2b2   : > { %1468 = vmatprep.subr.mxu1 %v1588_v59 }
 0x2b5   : > { %1469 = vmatpush3.xpose.msk.msra.mxu1 %vm1019_vm3, %v997_v36 }
 0x2b6   : > { %1470 = vmatprep.subr.mxu1 %v1588_v59 }
 0x2b9   : > { %1471 = vmatpush3.xpose.msk.msra.mxu1 %vm1019_vm3, %v996_v39 }
 0x2ba   : > { %1472 = vmatprep.subr.mxu1 %v1588_v59 }
 0x2bd   : > { %1473 = vmatpush3.xpose.msk.msra.mxu1 %vm1019_vm3, %v995_v40 }
 0x2be   : > { %1474 = vmatprep.subr.mxu1 %v1588_v59 }
 0x2c1   : > { %1475 = vmatpush3.xpose.msk.msra.mxu1 %vm1019_vm3, %v994_v43 }
 0x2c2   : > { %1476 = vmatprep.subr.mxu1 %v1588_v59 }
 0x2c5   : > { %1477 = vmatpush3.xpose.msk.msra.mxu1 %vm1019_vm3, %v993_v44 }
 0x2c6   : > { %1478 = vmatprep.subr.mxu1 %v1588_v59 }
 0x2c9   : > { %1479 = vmatpush3.xpose.msk.msra.mxu1 %vm1019_vm3, %v992_v46 }
 0x2cc   : > { %1481 = vmatmul.mubr.msk.f32.vlgmr.msra.gmra.mxu1 %vm1019_vm3, %v1008_v47 }
 0x38c   : > { %v1137_v53 = vpop.f32.mrf.mxu1 }
 0x38d   : > { %v1138_v54 = vadd.f32 %v1137_v53, %v1018_v52 }
 0x38e   : > { %v1482_v55 = vpop.f32.mrf.mxu1 }
 0x38f   : > { %1141 = vst [vmem:[%s327_s27] sm:$0x1] %v1138_v54 }
 0x390   : > { %1539 = shalt.err (!%p1536_p3)
}
 0x391   : > { %s1540_s26 = scalar_lea.hbm %s1847_s10, 16  ;;  %s1544_s25 = scalar_lea.hbm %s1891_s9, 32 }
 0x392   : > { %p1541_p4 = scmp.ne.s32.totalorder %s1847_s10, %s1540_s26  ;;  %p1545_p9 = scmp.lt.s32.totalorder %s1847_s10, %s1891_s9 }
 0x393   : > { %p1546_p10 = scmp.lt.s32.totalorder %s1544_s25, %s1540_s26 }
 0x394   : > { %p1542_p7 = pnand %p1541_p4, %p1680_p5 }
 0x395   : > { %p1547_p11 = por %p1546_p10, %p1545_p9 }
 0x396   : > { %p1543_p8 = pneg %p1542_p7 }
 0x398   : > { %p1548_p12 = pnand %p1547_p11, %p1543_p8 }
 0x39a   : > { %1551 = shalt.err (!%p1548_p12)
}
 0x39b   : > { %1483 = dma.vmem_to_hbm [thread:$0]  (%p1680_p5), %s1156_s28, 16, %s1847_s10, %s1143_s8  }
 0x39c PF: > { %p1489_p13 = scmp.ge.s32.totalorder %s1586_s14, 2  ;;  %s1167_s30 = sand.u32 1, %s1574_s11  }
 0x39d   : > { %s1168_s15 = scalar_lea.sflag [#allocation4], %s1167_s30 }
 0x39e   : > { %p1486_p0 = pnand %p1489_p13, %p1684_p6 }
 0x3a0   : > { %p1487_p1 = pneg %p1486_p0 }
 0x3a2   : > { %1569 = dma.done.wait (%p1487_p1), %s1168_s15, 16  }
 0x3a3   : > { %1571 = vsyncadd (%p1487_p1), %s1168_s15, 4294967280  ;;  %p21_p2 = scmp.ge.s32.totalorder %s1668_s16, 4   ;;  %s1894_s11 = smov %s1578_s12 }
 0x3a4   : > { %s1895_s12 = smov %s1582_s13  ;;  %s1896_s13 = smov %s1678_s19 }
 0x3a5   : > { %s1897_s14 = smov %s1668_s16  ;;  %23 = sbr.rel (!%p21_p2) target bundleno = 6 (0x6), region = 91 }
 0x3aa   :  { %1172 = vsyncpa [#allocation4], 1 }
 0x3ab   :  { %1174 = vsyncpa [#allocation4 + $0x1], 1 }

</bundles_post_ra>
